<compile_context>
chip_gen: v6e
topology: v6e:2x2x1
jax: 0.10.0
libtpu: 0.0.40
codegen_flags: <defaults>
</compile_context>

<pallas_src>
import math
from functools import partial

import jax
import jax.numpy as jnp
from jax.experimental import pallas as pl
from jax.experimental.pallas import tpu as pltpu

_GRANULE = 16            # row granularity (bf16 sublane pack friendly, >= 8)
_MAX_BATCH_TILE = 8192   # amortizes ~0.35us/step overhead; double-buffered tiles
                         # stay well under 32 MiB VMEM on v5e/v6e/v7x


def _round_up(x, m):
    return (x + m - 1) // m * m


def _make_mlp_kernel(num_hidden_linear: int, negative_slope: float = 0.2,
                     matmul_dtype=jnp.float32):
    """Kernel signature:
        kernel(z_ref,
               w0_ref, b0_ref, ..., w_{H-1}_ref, b_{H-1}_ref,   # hidden layers
               w_freq_ref, b_freq_ref, w_phase_ref, b_phase_ref,
               freq_out_ref, phase_out_ref)
    Hidden layers: matmul (f32 accumulation) + bias + LeakyReLU(0.2).
    Final layer is split into freq/phase halves and written directly to the
    output refs (no full-width temp)."""

    def kernel(*refs):
        z_ref = refs[0]
        freq_ref, phase_ref = refs[-2], refs[-1]
        wb = refs[1:-2]

        x = z_ref[...].astype(matmul_dtype)            # cast on VPU, free here
        for i in range(num_hidden_linear):
            w = wb[2 * i][...]                         # (in_i, out_i)
            b = wb[2 * i + 1][...]                     # (1, out_i), f32
            acc = jnp.dot(x, w, preferred_element_type=jnp.float32) + b
            acc = jnp.maximum(acc, negative_slope * acc)   # LeakyReLU(0.2)
            x = acc.astype(matmul_dtype)

        base = 2 * num_hidden_linear
        w_f, b_f = wb[base][...], wb[base + 1][...]
        w_p, b_p = wb[base + 2][...], wb[base + 3][...]
        freq_ref[...] = (jnp.dot(x, w_f, preferred_element_type=jnp.float32)
                         + b_f).astype(freq_ref.dtype)
        phase_ref[...] = (jnp.dot(x, w_p, preferred_element_type=jnp.float32)
                          + b_p).astype(phase_ref.dtype)

    return kernel


def init_custom_mapping_network_params(key, in_features, map_hidden_layers,
                                        map_hidden_dim, map_output_dim):
    """Parameter init mirroring the PyTorch module:
       - kaiming_normal_(a=0.2, fan_in, leaky_relu) on every Linear weight
       - default PyTorch Linear bias init: U(-1/sqrt(fan_in), 1/sqrt(fan_in))
       - final layer weight scaled by 0.25
    Weights are stored transposed to (in, out) so the kernel does x @ W."""
    dims = [in_features] + [map_hidden_dim] * map_hidden_layers + [map_output_dim]
    params = []
    a = 0.2
    gain = math.sqrt(2.0 / (1.0 + a * a))
    num_linear = len(dims) - 1
    for li in range(num_linear):
        fan_in, fan_out = dims[li], dims[li + 1]
        key, kw, kb = jax.random.split(key, 3)
        std = gain / math.sqrt(fan_in)
        w = jax.random.normal(kw, (fan_in, fan_out), dtype=jnp.float32) * std
        bound = 1.0 / math.sqrt(fan_in)
        b = jax.random.uniform(kb, (1, fan_out), dtype=jnp.float32,
                               minval=-bound, maxval=bound)
        if li == num_linear - 1:
            w = w * 0.25
        params.append((w, b))
    return params


def _pick_batch_tile(B):
    """Batch tile: ragged-grid friendly, >= 2 grid steps for large B (v7x)."""
    if B <= 2 * _GRANULE:
        return max(_round_up(B, 8), 8)
    tb = _round_up(-(-B // 2), _GRANULE)          # cdiv(B, 2) rounded up
    return min(_MAX_BATCH_TILE, tb)


@partial(jax.jit, static_argnames=("map_output_dim", "matmul_dtype"))
def custom_mapping_network_forward(z, params_flat, map_output_dim,
                                   matmul_dtype=jnp.float32):
    """z: (B, in_features) float32. params_flat: (w0, b0, w1, b1, ...) with
    weights already (in, out). Returns (frequencies, phase_shifts), each
    (B, map_output_dim // 2) float32."""
    assert map_output_dim % 2 == 0, "map_output_dim must be even for the split"
    num_linear = len(params_flat) // 2
    num_hidden = num_linear - 1
    B, in_features = z.shape
    half = map_output_dim // 2

    # ---- batch tiling: 1-D ragged grid over rows (no wrapper-side pad/cast) ----
    tb = _pick_batch_tile(B)
    grid = (pl.cdiv(B, tb),)

    # ---- param prep: hidden layers as-is; final layer split into halves -------
    prepped = []
    for li in range(num_hidden):
        prepped.append(params_flat[2 * li].astype(matmul_dtype))
        prepped.append(params_flat[2 * li + 1].astype(jnp.float32))
    w_last = params_flat[2 * num_hidden].astype(matmul_dtype)
    b_last = params_flat[2 * num_hidden + 1].astype(jnp.float32)
    prepped.extend([w_last[:, :half], b_last[:, :half],
                    w_last[:, half:], b_last[:, half:]])

    kernel = _make_mlp_kernel(num_hidden, matmul_dtype=matmul_dtype)

    z_spec = pl.BlockSpec((tb, in_features), lambda i: (i, 0))
    # Constant index_map -> weights/biases stay VMEM-resident across grid steps.
    param_specs = [pl.BlockSpec(p.shape, lambda i: (0, 0)) for p in prepped]
    out_specs = (pl.BlockSpec((tb, half), lambda i: (i, 0)),
                 pl.BlockSpec((tb, half), lambda i: (i, 0)))
    out_shape = (jax.ShapeDtypeStruct((B, half), jnp.float32),
                 jax.ShapeDtypeStruct((B, half), jnp.float32))

    layer_dims = ([in_features] + [params_flat[2 * li].shape[1]
                                   for li in range(num_linear)])
    flops = 2 * B * sum(layer_dims[i] * layer_dims[i + 1]
                        for i in range(num_linear))
    bytes_accessed = (B * in_features * 4
                      + sum(int(p.size) * jnp.dtype(p.dtype).itemsize
                            for p in prepped)
                      + B * map_output_dim * 4)

    freqs, phases = pl.pallas_call(
        kernel,
        out_shape=out_shape,
        grid=grid,
        in_specs=[z_spec] + param_specs,
        out_specs=out_specs,
        compiler_params=pltpu.CompilerParams(
            dimension_semantics=("parallel",),           # megacore-shard batch axis
            vmem_limit_bytes=32 * 1024 * 1024),           # explicit; safe on v5e/v6e/v7x
        cost_estimate=pl.CostEstimate(flops=flops, transcendentals=0,
                                      bytes_accessed=bytes_accessed),
    )(z, *prepped)

    return freqs, phases


def _reference_forward(z, params, matmul_dtype=jnp.float32, negative_slope=0.2):
    """Pure-JAX reference with the same precision policy as the kernel."""
    x = z.astype(matmul_dtype)
    for i, (w, b) in enumerate(params):
        acc = jnp.dot(x, w.astype(matmul_dtype),
                      preferred_element_type=jnp.float32) + b
        if i < len(params) - 1:
            acc = jnp.maximum(acc, negative_slope * acc)
            x = acc.astype(matmul_dtype)
        else:
            x = acc
    return x


if __name__ == "__main__":
    # Small, module-consistent shapes.
    in_features = 16
    map_hidden_layers = 2
    map_hidden_dim = 32
    map_output_dim = 64
    batch = 8

    key = jax.random.PRNGKey(0)
    key_params, key_z, key_z2 = jax.random.split(key, 3)

    params = init_custom_mapping_network_params(
        key_params, in_features, map_hidden_layers, map_hidden_dim, map_output_dim)
    params_flat = tuple(p for wb in params for p in wb)

    z = jax.random.normal(key_z, (batch, in_features), dtype=jnp.float32)

    frequencies, phase_shifts = custom_mapping_network_forward(
        z, params_flat, map_output_dim)
    jax.block_until_ready((frequencies, phase_shifts))

    half = map_output_dim // 2
    ref = _reference_forward(z, params)
    assert frequencies.shape == (batch, half)
    assert phase_shifts.shape == (batch, half)
    assert jnp.allclose(frequencies, ref[..., :half], atol=1e-3, rtol=1e-3)
    assert jnp.allclose(phase_shifts, ref[..., half:], atol=1e-3, rtol=1e-3)

    # Exercise the multi-step ragged batch grid (B not a multiple of the tile).
    batch_big = 20000
    z_big = jax.random.normal(key_z2, (batch_big, in_features), dtype=jnp.float32)
    f_big, p_big = custom_mapping_network_forward(z_big, params_flat, map_output_dim)
    jax.block_until_ready((f_big, p_big))
    ref_big = _reference_forward(z_big, params)
    assert f_big.shape == (batch_big, half)
    assert p_big.shape == (batch_big, half)
    assert jnp.allclose(f_big, ref_big[..., :half], atol=1e-3, rtol=1e-3)
    assert jnp.allclose(p_big, ref_big[..., half:], atol=1e-3, rtol=1e-3)

    print("KERNEL_OK")
</pallas_src>

<mosaic_0001>
module attributes {stable_mosaic.version = 11 : i64} {
  func.func @kernel(%arg0: i32, %arg1: memref<8x16xf32, #tpu.memory_space<vmem>>, %arg2: memref<16x32xf32, #tpu.memory_space<vmem>>, %arg3: memref<1x32xf32, #tpu.memory_space<vmem>>, %arg4: memref<32x32xf32, #tpu.memory_space<vmem>>, %arg5: memref<1x32xf32, #tpu.memory_space<vmem>>, %arg6: memref<32x32xf32, #tpu.memory_space<vmem>>, %arg7: memref<1x32xf32, #tpu.memory_space<vmem>>, %arg8: memref<32x32xf32, #tpu.memory_space<vmem>>, %arg9: memref<1x32xf32, #tpu.memory_space<vmem>>, %arg10: memref<8x32xf32, #tpu.memory_space<vmem>>, %arg11: memref<8x32xf32, #tpu.memory_space<vmem>>) attributes {dimension_semantics = [#tpu.dimension_semantics<parallel>], iteration_bounds = array<i64: 1>, scalar_prefetch = 0 : i64, scratch_operands = 0 : i64, tpu.core_type = #tpu.core_type<tc>, window_params = [{transform_indices = @transform_0, window_bounds = array<i64: 8, 16>}, {pipeline_mode = #tpu.pipeline_mode<synchronous>, transform_indices = @transform_1, window_bounds = array<i64: 16, 32>}, {pipeline_mode = #tpu.pipeline_mode<synchronous>, transform_indices = @transform_2, window_bounds = array<i64: 1, 32>}, {pipeline_mode = #tpu.pipeline_mode<synchronous>, transform_indices = @transform_3, window_bounds = array<i64: 32, 32>}, {pipeline_mode = #tpu.pipeline_mode<synchronous>, transform_indices = @transform_4, window_bounds = array<i64: 1, 32>}, {pipeline_mode = #tpu.pipeline_mode<synchronous>, transform_indices = @transform_5, window_bounds = array<i64: 32, 32>}, {pipeline_mode = #tpu.pipeline_mode<synchronous>, transform_indices = @transform_6, window_bounds = array<i64: 1, 32>}, {pipeline_mode = #tpu.pipeline_mode<synchronous>, transform_indices = @transform_7, window_bounds = array<i64: 32, 32>}, {pipeline_mode = #tpu.pipeline_mode<synchronous>, transform_indices = @transform_8, window_bounds = array<i64: 1, 32>}, {transform_indices = @transform_9, window_bounds = array<i64: 8, 32>}, {transform_indices = @transform_10, window_bounds = array<i64: 8, 32>}]} {
    %c0 = arith.constant 0 : index
    %c0_0 = arith.constant 0 : index
    %0 = vector.load %arg1[%c0, %c0_0] : memref<8x16xf32, #tpu.memory_space<vmem>>, vector<8x16xf32>
    %c0_1 = arith.constant 0 : index
    %c0_2 = arith.constant 0 : index
    %1 = vector.load %arg2[%c0_1, %c0_2] : memref<16x32xf32, #tpu.memory_space<vmem>>, vector<16x32xf32>
    %c0_3 = arith.constant 0 : index
    %c0_4 = arith.constant 0 : index
    %2 = vector.load %arg3[%c0_3, %c0_4] : memref<1x32xf32, #tpu.memory_space<vmem>>, vector<1x32xf32>
    %cst = arith.constant dense<0.000000e+00> : vector<8x32xf32>
    %3 = tpu.matmul %0, %1, %cst {dimension_numbers = #tpu.dot_dimension_numbers<[1], [0], [0], [1], [0, 0, 1, 1], [], []>} : vector<8x16xf32>, vector<16x32xf32>, vector<8x32xf32> -> vector<8x32xf32>
    %4 = vector.broadcast %2 : vector<1x32xf32> to vector<8x32xf32>
    %5 = arith.addf %3, %4 : vector<8x32xf32>
    %cst_5 = arith.constant 2.000000e-01 : f32
    %6 = vector.broadcast %cst_5 : f32 to vector<8x32xf32>
    %7 = arith.mulf %6, %5 : vector<8x32xf32>
    %8 = arith.maximumf %5, %7 : vector<8x32xf32>
    %c0_6 = arith.constant 0 : index
    %c0_7 = arith.constant 0 : index
    %9 = vector.load %arg4[%c0_6, %c0_7] : memref<32x32xf32, #tpu.memory_space<vmem>>, vector<32x32xf32>
    %c0_8 = arith.constant 0 : index
    %c0_9 = arith.constant 0 : index
    %10 = vector.load %arg5[%c0_8, %c0_9] : memref<1x32xf32, #tpu.memory_space<vmem>>, vector<1x32xf32>
    %cst_10 = arith.constant dense<0.000000e+00> : vector<8x32xf32>
    %11 = tpu.matmul %8, %9, %cst_10 {dimension_numbers = #tpu.dot_dimension_numbers<[1], [0], [0], [1], [0, 0, 1, 1], [], []>} : vector<8x32xf32>, vector<32x32xf32>, vector<8x32xf32> -> vector<8x32xf32>
    %12 = vector.broadcast %10 : vector<1x32xf32> to vector<8x32xf32>
    %13 = arith.addf %11, %12 : vector<8x32xf32>
    %cst_11 = arith.constant 2.000000e-01 : f32
    %14 = vector.broadcast %cst_11 : f32 to vector<8x32xf32>
    %15 = arith.mulf %14, %13 : vector<8x32xf32>
    %16 = arith.maximumf %13, %15 : vector<8x32xf32>
    %c0_12 = arith.constant 0 : index
    %c0_13 = arith.constant 0 : index
    %17 = vector.load %arg6[%c0_12, %c0_13] : memref<32x32xf32, #tpu.memory_space<vmem>>, vector<32x32xf32>
    %c0_14 = arith.constant 0 : index
    %c0_15 = arith.constant 0 : index
    %18 = vector.load %arg7[%c0_14, %c0_15] : memref<1x32xf32, #tpu.memory_space<vmem>>, vector<1x32xf32>
    %c0_16 = arith.constant 0 : index
    %c0_17 = arith.constant 0 : index
    %19 = vector.load %arg8[%c0_16, %c0_17] : memref<32x32xf32, #tpu.memory_space<vmem>>, vector<32x32xf32>
    %c0_18 = arith.constant 0 : index
    %c0_19 = arith.constant 0 : index
    %20 = vector.load %arg9[%c0_18, %c0_19] : memref<1x32xf32, #tpu.memory_space<vmem>>, vector<1x32xf32>
    %cst_20 = arith.constant dense<0.000000e+00> : vector<8x32xf32>
    %21 = tpu.matmul %16, %17, %cst_20 {dimension_numbers = #tpu.dot_dimension_numbers<[1], [0], [0], [1], [0, 0, 1, 1], [], []>} : vector<8x32xf32>, vector<32x32xf32>, vector<8x32xf32> -> vector<8x32xf32>
    %22 = vector.broadcast %18 : vector<1x32xf32> to vector<8x32xf32>
    %23 = arith.addf %21, %22 : vector<8x32xf32>
    %c0_21 = arith.constant 0 : index
    %c0_22 = arith.constant 0 : index
    %24 = vector.load %arg10[%c0_21, %c0_22] : memref<8x32xf32, #tpu.memory_space<vmem>>, vector<8x32xf32>
    tpu.vector_store %arg10[%c0_21, %c0_22], %23 {strides = array<i32>} : memref<8x32xf32, #tpu.memory_space<vmem>>, vector<8x32xf32>,
    %cst_23 = arith.constant dense<0.000000e+00> : vector<8x32xf32>
    %25 = tpu.matmul %16, %19, %cst_23 {dimension_numbers = #tpu.dot_dimension_numbers<[1], [0], [0], [1], [0, 0, 1, 1], [], []>} : vector<8x32xf32>, vector<32x32xf32>, vector<8x32xf32> -> vector<8x32xf32>
    %26 = vector.broadcast %20 : vector<1x32xf32> to vector<8x32xf32>
    %27 = arith.addf %25, %26 : vector<8x32xf32>
    %c0_24 = arith.constant 0 : index
    %c0_25 = arith.constant 0 : index
    %28 = vector.load %arg11[%c0_24, %c0_25] : memref<8x32xf32, #tpu.memory_space<vmem>>, vector<8x32xf32>
    tpu.vector_store %arg11[%c0_24, %c0_25], %27 {strides = array<i32>} : memref<8x32xf32, #tpu.memory_space<vmem>>, vector<8x32xf32>,
    return
  }
  func.func @transform_0(%arg0: i32) -> (i32, i32) {
    %c0_i32 = arith.constant 0 : i32
    %c0_i32_0 = arith.constant 0 : i32
    return %arg0, %c0_i32 : i32, i32
  }
  func.func @transform_1(%arg0: i32) -> (i32, i32) {
    %c0_i32 = arith.constant 0 : i32
    %c0_i32_0 = arith.constant 0 : i32
    %c0_i32_1 = arith.constant 0 : i32
    return %c0_i32, %c0_i32_0 : i32, i32
  }
  func.func @transform_2(%arg0: i32) -> (i32, i32) {
    %c0_i32 = arith.constant 0 : i32
    %c0_i32_0 = arith.constant 0 : i32
    %c0_i32_1 = arith.constant 0 : i32
    return %c0_i32, %c0_i32_0 : i32, i32
  }
  func.func @transform_3(%arg0: i32) -> (i32, i32) {
    %c0_i32 = arith.constant 0 : i32
    %c0_i32_0 = arith.constant 0 : i32
    %c0_i32_1 = arith.constant 0 : i32
    return %c0_i32, %c0_i32_0 : i32, i32
  }
  func.func @transform_4(%arg0: i32) -> (i32, i32) {
    %c0_i32 = arith.constant 0 : i32
    %c0_i32_0 = arith.constant 0 : i32
    %c0_i32_1 = arith.constant 0 : i32
    return %c0_i32, %c0_i32_0 : i32, i32
  }
  func.func @transform_5(%arg0: i32) -> (i32, i32) {
    %c0_i32 = arith.constant 0 : i32
    %c0_i32_0 = arith.constant 0 : i32
    %c0_i32_1 = arith.constant 0 : i32
    return %c0_i32, %c0_i32_0 : i32, i32
  }
  func.func @transform_6(%arg0: i32) -> (i32, i32) {
    %c0_i32 = arith.constant 0 : i32
    %c0_i32_0 = arith.constant 0 : i32
    %c0_i32_1 = arith.constant 0 : i32
    return %c0_i32, %c0_i32_0 : i32, i32
  }
  func.func @transform_7(%arg0: i32) -> (i32, i32) {
    %c0_i32 = arith.constant 0 : i32
    %c0_i32_0 = arith.constant 0 : i32
    %c0_i32_1 = arith.constant 0 : i32
    return %c0_i32, %c0_i32_0 : i32, i32
  }
  func.func @transform_8(%arg0: i32) -> (i32, i32) {
    %c0_i32 = arith.constant 0 : i32
    %c0_i32_0 = arith.constant 0 : i32
    %c0_i32_1 = arith.constant 0 : i32
    return %c0_i32, %c0_i32_0 : i32, i32
  }
  func.func @transform_9(%arg0: i32) -> (i32, i32) {
    %c0_i32 = arith.constant 0 : i32
    %c0_i32_0 = arith.constant 0 : i32
    return %arg0, %c0_i32 : i32, i32
  }
  func.func @transform_10(%arg0: i32) -> (i32, i32) {
    %c0_i32 = arith.constant 0 : i32
    %c0_i32_0 = arith.constant 0 : i32
    return %arg0, %c0_i32 : i32, i32
  }
}

</mosaic_0001>

<bundles_post_ra>
// kernel: custom_mapping_network_forward.1
= control target key start
LH: loop header
LB: loop body
LE: loop exit
PB: predicated region body
PF: predicated region fallthrough
CT: control target
= control target key end

     0   :  { %16 = vsyncpa [#allocation3], 0  ;;  %v518_v1 = vmov 0.0   ;;  %vm519_vm0 = vmmov 0   ;;  %s649_s0 = inlined_call_operand.vmem [shape: f32[8,16], index: 0, kind: input, shape index: {}]   ;;  %s650_s1 = inlined_call_operand.vmem [shape: f32[16,32], index: 1, kind: input, shape index: {}]   ;;  %s651_s2 = inlined_call_operand.vmem [shape: f32[1,32], index: 2, kind: input, shape index: {}]   ;;  %s652_s3 = inlined_call_operand.vmem [shape: f32[32,32], index: 3, kind: input, shape index: {}]   ;;  %s653_s4 = inlined_call_operand.vmem [shape: f32[1,32], index: 4, kind: input, shape index: {}]   ;;  %s654_s5 = inlined_call_operand.vmem [shape: f32[32,32], index: 5, kind: input, shape index: {}]   ;;  %s655_s6 = inlined_call_operand.vmem [shape: f32[1,32], index: 6, kind: input, shape index: {}]   ;;  %s656_s7 = inlined_call_operand.vmem [shape: f32[32,32], index: 7, kind: input, shape index: {}]   ;;  %s657_s8 = inlined_call_operand.vmem [shape: f32[1,32], index: 8, kind: input, shape index: {}]   ;;  %s658_s9 = inlined_call_operand.hbm [shape: f32[8,32], index: 9, kind: output, shape index: {0}]   ;;  %s659_s10 = inlined_call_operand.hbm [shape: f32[8,32], index: 10, kind: output, shape index: {1}]  }
   0x1   :  { %v38_v0 = vld [vmem:[%s650_s1 + $0x8] sm:$0xff]  ;;  %430 = vmatprep.subr.mxu0 %v518_v1  ;;  %v37_v2 = vld [vmem:[%s650_s1] sm:$0xff]  ;;  %434 = vmatprep.mubr.msk.f32.mxu0 %vm519_vm0, %v518_v1 }
   0x2   :  { %17 = vsyncpa [#allocation5], 0  ;;  %431 = vmatpush3.msra.mxu0 %v38_v0  ;;  %v36_v3 = vld [vmem:[%s649_s0] sm:$0xff]  ;;  %vm46_vm1 = vcmask 130048   ;;  %437 = vmatprep.subr.mxu1 %v518_v1  ;;  %v125_v4 = vld [vmem:[%s652_s3 + $0x18] sm:$0xff]  ;;  %vm133_vm2 = vcmask 261120  }
   0x3   :  { %432 = vmatprep.subr.mxu0 %v518_v1  ;;  %445 = vmatprep.mubr.msk.f32.mxu1 %vm519_vm0, %v518_v1  ;;  %v124_v5 = vld [vmem:[%s652_s3 + $0x10] sm:$0xff]  ;;  %v123_v6 = vld [vmem:[%s652_s3 + $0x8] sm:$0xff]  ;;  %v122_v7 = vld [vmem:[%s652_s3] sm:$0xff]  ;;  %s520_s23 = smov [#allocation2]  }
   0x4   :  { %433 = vmatpush3.msra.mxu0 %v37_v2  ;;  %438 = vmatpush3.msra.mxu1 %v125_v4  ;;  %v404_v8 = vld [vmem:[%s651_s2] ss:$0 sm:$0xff]  ;;  %v212_v14 = vld [vmem:[%s654_s5 + $0x18] sm:$0xff]  ;;  %v211_v16 = vld [vmem:[%s654_s5 + $0x10] sm:$0xff]  ;;  %s382_s24 = sshll.u32 %s520_s23, 4  ;;  %s383_s24 = int_to_ptr.vmem [resolvable:$true] %s382_s24 }
   0x5   :  { %435 = vmatmul.mubr.msk.f32.vlgmr.msra.gmra.mxu0 %vm46_vm1, %v36_v3  ;;  %448 = vmatprep.subr.mxu0 %v518_v1  ;;  %v217_v15 = vld [vmem:[%s656_s7 + $0x18] sm:$0xff]  ;;  %v216_v17 = vld [vmem:[%s656_s7 + $0x10] sm:$0xff]  ;;  %v210_v18 = vld [vmem:[%s654_s5 + $0x8] sm:$0xff]  ;;  %p479_p1 = scmp.lt.s32.totalorder %s383_s24, %s383_s24 }
   0x6   :  { %456 = vmatprep.mubr.msk.f32.mxu0 %vm519_vm0, %v518_v1  ;;  %439 = vmatprep.subr.mxu1 %v518_v1  ;;  %v215_v19 = vld [vmem:[%s656_s7 + $0x8] sm:$0xff]  ;;  %v209_v20 = vld [vmem:[%s654_s5] sm:$0xff] }
   0x7   :  { %440 = vmatpush3.msra.mxu1 %v124_v5  ;;  %449 = vmatpush3.msra.mxu0 %v212_v14  ;;  %v214_v21 = vld [vmem:[%s656_s7] sm:$0xff] }
   0x8   :  { %441 = vmatprep.subr.mxu1 %v518_v1  ;;  %450 = vmatprep.subr.mxu0 %v518_v1  ;;  %v406_v22 = vld [vmem:[%s653_s4] ss:$0 sm:$0xff]  ;;  %s521_s4 = smov [#allocation4]  }
   0x9   :  { %442 = vmatpush3.msra.mxu1 %v123_v6  ;;  %451 = vmatpush3.msra.mxu0 %v211_v16  ;;  %v408_v28 = vld [vmem:[%s655_s6] ss:$0 sm:$0xff]  ;;  %s392_s25 = sshll.u32 %s521_s4, 4  ;;  %s474_s6 = scalar_lea.vmem %s383_s24, 128  ;;  %s393_s25 = int_to_ptr.vmem [resolvable:$true] %s392_s25 }
   0xa   :  { %443 = vmatprep.subr.mxu1 %v518_v1  ;;  %452 = vmatprep.subr.mxu0 %v518_v1  ;;  %v410_v29 = vld [vmem:[%s657_s8] ss:$0 sm:$0xff]  ;;  %p475_p0 = scmp.ne.s32.totalorder %s383_s24, %s474_s6  ;;  %p480_p2 = scmp.lt.s32.totalorder %s474_s6, %s474_s6 }
   0xb   :  { %444 = vmatpush3.msra.mxu1 %v122_v7  ;;  %453 = vmatpush3.msra.mxu0 %v210_v18 }
   0xc   :  { %459 = vmatprep.subr.mxu1 %v518_v1  ;;  %454 = vmatprep.subr.mxu0 %v518_v1  ;;  %p481_p3 = por %p480_p2, %p479_p1 }
   0xd   :  { %455 = vmatpush3.msra.mxu0 %v209_v20 }
   0xe   :  { %p482_p4 = pnand %p481_p3, %p475_p0 }
  0xc5   :  { %v116_v9 = vpop.f32.mrf.mxu0 }
  0xc6   :  { %v117_v10 = vadd.f32 %v404_v8, %v116_v9 }
  0xc7   :  { %v436_v11 = vpop.f32.mrf.mxu0 }
  0xc8   :  { %v120_v12 = vmul.f32 0.2, %v117_v10 }
  0xca   :  { %v121_v13 = vmax.f32 %v117_v10, %v120_v12 }
  0xcc   :  { %446 = vmatmul.mubr.msk.f32.vlgmr.msra.gmra.mxu1 %vm133_vm2, %v121_v13 }
  0xcd   :  { %467 = vmatprep.mubr.msk.f32.mxu1 %vm519_vm0, %v518_v1  ;;  %460 = vmatpush3.msra.mxu1 %v217_v15 }
  0xce   :  { %461 = vmatprep.subr.mxu1 %v518_v1 }
  0xcf   :  { %462 = vmatpush3.msra.mxu1 %v216_v17 }
  0xd0   :  { %463 = vmatprep.subr.mxu1 %v518_v1 }
  0xd1   :  { %464 = vmatpush3.msra.mxu1 %v215_v19 }
  0xd2   :  { %465 = vmatprep.subr.mxu1 %v518_v1 }
  0xd3   :  { %466 = vmatpush3.msra.mxu1 %v214_v21 }
 0x18c   :  { %v203_v23 = vpop.f32.mrf.mxu1 }
 0x18d   :  { %v204_v24 = vadd.f32 %v406_v22, %v203_v23 }
 0x18e   :  { %v447_v25 = vpop.f32.mrf.mxu1 }
 0x18f   :  { %v207_v26 = vmul.f32 0.2, %v204_v24 }
 0x191   :  { %v208_v27 = vmax.f32 %v204_v24, %v207_v26 }
 0x193   :  { %457 = vmatmul.mubr.msk.f32.vlgmr.msra.gmra.mxu0 %vm133_vm2, %v208_v27  ;;  %468 = vmatmul.mubr.msk.f32.vlgmr.msra.gmra.mxu1 %vm133_vm2, %v208_v27 }
 0x253   :  { %v294_v30 = vpop.f32.mrf.mxu0  ;;  %v371_v31 = vpop.f32.mrf.mxu1 }
 0x254   :  { %v295_v32 = vadd.f32 %v408_v28, %v294_v30  ;;  %v372_v33 = vadd.f32 %v410_v29, %v371_v31 }
 0x255   :  { %v458_v34 = vpop.f32.mrf.mxu0  ;;  %v469_v35 = vpop.f32.mrf.mxu1 }
 0x256   :  { %298 = vst.msk [vmem:[#allocation2] sm:$0xff] %vm133_vm2, %v295_v32  ;;  %375 = vst.msk [vmem:[#allocation4] sm:$0xff] %vm133_vm2, %v372_v33 }
 0x257   :  { %485 = shalt.err (!%p482_p4)
}
 0x258   :  { %385 = dma.vmem_to_hbm [thread:$0]  %s383_s24, 128, %s658_s9, [#allocation3]  }
 0x259   :  { %s494_s27 = scalar_lea.vmem %s393_s25, 128  ;;  %p499_p6 = scmp.lt.s32.totalorder %s393_s25, %s393_s25 }
 0x25a   :  { %p495_p5 = scmp.ne.s32.totalorder %s393_s25, %s494_s27  ;;  %p500_p7 = scmp.lt.s32.totalorder %s494_s27, %s494_s27 }
 0x25c   :  { %p501_p8 = por %p500_p7, %p499_p6 }
 0x25e   :  { %p502_p9 = pnand %p501_p8, %p495_p5 }
 0x260   :  { %505 = shalt.err (!%p502_p9)
}
 0x261   :  { %395 = dma.vmem_to_hbm [thread:$0]  %s393_s25, 128, %s659_s10, [#allocation5]  }
 0x262   :  { %514 = dma.done.wait [#allocation3], 128  }
 0x263   :  { %515 = vsyncadd [#allocation3], 4294967168 }
 0x264   :  { %516 = dma.done.wait [#allocation5], 128  }
 0x265   :  { %517 = vsyncadd [#allocation5], 4294967168 }
 0x266   :  { %402 = vsyncpa [#allocation3], 1 }
 0x267   :  { %403 = vsyncpa [#allocation5], 1 }

</bundles_post_ra>
